<compile_context>
chip_gen: v7x
topology: tpu7x:2x2x1
jax: 0.10.0
libtpu: 0.0.40
codegen_flags: <defaults>
</compile_context>

<pallas_src>
import functools

import jax
import jax.numpy as jnp
from jax import lax
from jax.experimental import pallas as pl
from jax.experimental.pallas import tpu as pltpu


# ---------------------------------------------------------------------------
# Pallas kernel: MixtureOfGaussians.forward
# ---------------------------------------------------------------------------
def _mog_kernel(pi_ref, gumbel_ref, mu_ref, sigma_ref, eps_ref, out_ref, *,
                n_components, d, inv_temperature):
    """One (TB, *) tile of rows.

    pi_ref, gumbel_ref : (TB, K)
    mu_ref, sigma_ref, eps_ref : (TB, K*D)   (lane-dense, component-major)
    out_ref : (TB, D)
    """
    K, D = n_components, d
    f32 = jnp.float32

    # ---- Gumbel-softmax over the K components, statically unrolled (K tiny) ----
    logits = [
        (pi_ref[:, k:k + 1].astype(f32) + gumbel_ref[:, k:k + 1].astype(f32))
        * inv_temperature
        for k in range(K)
    ]                                                   # K x (TB, 1)
    m = logits[0]
    for k in range(1, K):
        m = jnp.maximum(m, logits[k])
    exps = [jnp.exp(l - m) for l in logits]             # K x (TB, 1)
    denom = exps[0]
    for k in range(1, K):
        denom = denom + exps[k]
    inv_denom = 1.0 / denom                             # (TB, 1), exact

    # ---- Reparameterize + weighted mix:  sum_k w_k * (eps_k * sigma_k + mu_k) ----
    # Note: exp(2*log(sigma)/2) == sigma, so no log/exp needed.
    acc = None
    for k in range(K):
        w = exps[k] * inv_denom                         # (TB, 1)
        lo, hi = k * D, (k + 1) * D
        comp = (eps_ref[:, lo:hi].astype(f32) * sigma_ref[:, lo:hi].astype(f32)
                + mu_ref[:, lo:hi].astype(f32))          # (TB, D)
        term = w * comp
        acc = term if acc is None else acc + term
    out_ref[...] = acc.astype(out_ref.dtype)


def _choose_block_rows(B, K, D):
    """Pick a batch tile size that stays well inside scoped VMEM (v7x-safe)."""
    # f32 bytes per row across all tiles held per grid step (3 big inputs + out + pi/gumbel).
    row_bytes = 4 * (3 * K * D + D + 2 * K)
    budget = 8 << 20  # ~8 MiB live per pipeline stage; x2 double-buffering << 32 MiB default.
    tb = max(8, budget // (2 * row_bytes))
    tb = int(min(tb, 1024))
    if B <= tb:
        return B
    return (tb // 8) * 8  # keep sublane-aligned for partial-B grids


def mixture_of_gaussians(pi, mu, sigma, gumbel, eps, temperature=1.0, *,
                         block_rows=None):
    """pi,gumbel: (B,K); mu,sigma,eps: (B,K,D); returns (B,D)."""
    B, K, D = mu.shape
    assert pi.shape == (B, K) and gumbel.shape == (B, K)
    assert sigma.shape == mu.shape and eps.shape == mu.shape

    # Lane-dense layout: (B, K, D) -> (B, K*D).  Contiguous reshape, no data reorder.
    mu2 = mu.reshape(B, K * D)
    sigma2 = sigma.reshape(B, K * D)
    eps2 = eps.reshape(B, K * D)

    tb = block_rows if block_rows is not None else _choose_block_rows(B, K, D)
    tb = min(tb, B)
    grid = (pl.cdiv(B, tb),)

    kernel = functools.partial(
        _mog_kernel,
        n_components=K,
        d=D,
        inv_temperature=1.0 / float(temperature),
    )
    return pl.pallas_call(
        kernel,
        out_shape=jax.ShapeDtypeStruct((B, D), mu.dtype),
        grid=grid,
        in_specs=[
            pl.BlockSpec((tb, K), lambda i: (i, 0)),         # pi
            pl.BlockSpec((tb, K), lambda i: (i, 0)),         # gumbel noise
            pl.BlockSpec((tb, K * D), lambda i: (i, 0)),     # mu
            pl.BlockSpec((tb, K * D), lambda i: (i, 0)),     # sigma
            pl.BlockSpec((tb, K * D), lambda i: (i, 0)),     # eps
        ],
        out_specs=pl.BlockSpec((tb, D), lambda i: (i, 0)),
        compiler_params=pltpu.CompilerParams(
            dimension_semantics=("parallel",)),
    )(pi, gumbel, mu2, sigma2, eps2)


# ---------------------------------------------------------------------------
# GaussianMixtureLayer (plain JAX glue) + full feat2Pro forward
# ---------------------------------------------------------------------------
def init_gaussian_mixture_params(key, in_channels, latent_dim, num_classes,
                                 n_components):
    ks = jax.random.split(key, 5)
    s = 0.1
    return {
        "w1": jax.random.normal(ks[0], (in_channels, in_channels, 3, 3), jnp.float32) * s,
        "b1": jnp.zeros((in_channels,), jnp.float32),
        "w2": jax.random.normal(ks[1], (latent_dim, in_channels, 3, 3), jnp.float32) * s,
        "b2": jnp.zeros((latent_dim,), jnp.float32),
        "w_mu": jax.random.normal(ks[2], (latent_dim, num_classes * n_components), jnp.float32) * s,
        "b_mu": jnp.zeros((num_classes * n_components,), jnp.float32),
        "w_sigma": jax.random.normal(ks[3], (latent_dim, num_classes * n_components), jnp.float32) * s,
        "b_sigma": jnp.zeros((num_classes * n_components,), jnp.float32),
        "w_pi": jax.random.normal(ks[4], (latent_dim, n_components), jnp.float32) * s,
        "b_pi": jnp.zeros((n_components,), jnp.float32),
    }


def gaussian_mixture_layer(params, x, n_components, num_classes):
    """Conv encoder + avg pool + mu/sigma/pi heads (matches the torch module)."""
    dn = ("NCHW", "OIHW", "NCHW")
    h = lax.conv_general_dilated(x, params["w1"], (1, 1), "SAME", dimension_numbers=dn)
    h = jax.nn.relu(h + params["b1"][None, :, None, None])
    h = lax.conv_general_dilated(h, params["w2"], (1, 1), "SAME", dimension_numbers=dn)
    h = jax.nn.relu(h + params["b2"][None, :, None, None])
    pooled = jnp.mean(h, axis=(2, 3))  # AvgPool2d((size, size)) with H == W == size
    B = x.shape[0]
    mu = (pooled @ params["w_mu"] + params["b_mu"]).reshape(B, n_components, num_classes)
    sigma = jax.nn.softplus(pooled @ params["w_sigma"] + params["b_sigma"]).reshape(
        B, n_components, num_classes)
    pi = jax.nn.softmax(pooled @ params["w_pi"] + params["b_pi"], axis=1)
    return pi, mu, sigma


def _sample_noise(key, pi_shape, mu_shape, dtype):
    kg, ke = jax.random.split(key)
    gumbel = -jnp.log(jax.random.exponential(kg, pi_shape, dtype=dtype))
    eps = jax.random.normal(ke, mu_shape, dtype=dtype)
    return gumbel, eps


def feat2pro_forward(params, x, noise_key, n_components, num_classes,
                     temperature=1.0):
    pi, mu, sigma = gaussian_mixture_layer(params, x, n_components, num_classes)
    gumbel, eps = _sample_noise(noise_key, pi.shape, mu.shape, mu.dtype)
    return mixture_of_gaussians(pi, mu, sigma, gumbel, eps, temperature)


# ---------------------------------------------------------------------------
# Pure-JAX reference (mirrors the torch MixtureOfGaussians, incl. the log/exp path)
# ---------------------------------------------------------------------------
def _mog_reference(pi, mu, sigma, gumbel, eps, temperature=1.0):
    logits = (pi + gumbel) / temperature
    weights = jax.nn.softmax(logits, axis=-1)
    log_var = 2.0 * jnp.log(sigma)
    std = jnp.exp(0.5 * log_var)
    samples = eps * std + mu                                   # (B, K, D)
    return jnp.sum(weights[:, :, None] * samples, axis=1)      # (B, D)


if __name__ == "__main__":
    key = jax.random.PRNGKey(0)
    k_param, k_x, k_noise, k_big = jax.random.split(key, 4)

    # --- full feat2Pro forward on a small image batch ---
    B, C, H, W = 2, 4, 16, 16
    latent_dim, num_classes, n_components = 32, 64, 2
    x = jax.random.normal(k_x, (B, C, H, W), dtype=jnp.float32)
    params = init_gaussian_mixture_params(k_param, C, latent_dim, num_classes,
                                          n_components)

    out = feat2pro_forward(params, x, k_noise, n_components, num_classes,
                           temperature=1.0)
    out = jax.block_until_ready(out)
    assert out.shape == (B, num_classes)

    # reference: same glue, same noise, pure-JAX MoG
    pi, mu, sigma = gaussian_mixture_layer(params, x, n_components, num_classes)
    gumbel, eps = _sample_noise(k_noise, pi.shape, mu.shape, mu.dtype)
    ref = _mog_reference(pi, mu, sigma, gumbel, eps, temperature=1.0)
    assert jnp.allclose(out, ref, atol=1e-5, rtol=1e-5), "feat2Pro mismatch vs reference"

    # --- exercise the tiled (grid > 1) MoG path directly on a larger batch ---
    B2, K2, D2 = 64, 2, 64
    kb = jax.random.split(k_big, 5)
    pi2 = jax.random.normal(kb[0], (B2, K2), jnp.float32)
    mu2 = jax.random.normal(kb[1], (B2, K2, D2), jnp.float32)
    sigma2 = jax.nn.softplus(jax.random.normal(kb[2], (B2, K2, D2))) + 0.1
    gumbel2 = -jnp.log(jax.random.exponential(kb[3], (B2, K2), dtype=jnp.float32))
    eps2 = jax.random.normal(kb[4], (B2, K2, D2), jnp.float32)

    out2 = mixture_of_gaussians(pi2, mu2, sigma2.astype(jnp.float32), gumbel2,
                                eps2, temperature=2.0, block_rows=16)
    out2 = jax.block_until_ready(out2)
    ref2 = _mog_reference(pi2, mu2, sigma2, gumbel2, eps2, temperature=2.0)
    assert jnp.allclose(out2, ref2, atol=1e-5, rtol=1e-5), "tiled MoG mismatch vs reference"

    print("KERNEL_OK")
</pallas_src>

<mosaic_0001>
module attributes {stable_mosaic.version = 11 : i64} {
  func.func @_mog_kernel(%arg0: i32, %arg1: memref<2x2xf32, #tpu.memory_space<vmem>>, %arg2: memref<2x2xf32, #tpu.memory_space<vmem>>, %arg3: memref<2x128xf32, #tpu.memory_space<vmem>>, %arg4: memref<2x128xf32, #tpu.memory_space<vmem>>, %arg5: memref<2x128xf32, #tpu.memory_space<vmem>>, %arg6: memref<2x64xf32, #tpu.memory_space<vmem>>) attributes {dimension_semantics = [#tpu.dimension_semantics<parallel>], iteration_bounds = array<i64: 1>, scalar_prefetch = 0 : i64, scratch_operands = 0 : i64, tpu.core_type = #tpu.core_type<tc>, window_params = [{transform_indices = @transform_0, window_bounds = array<i64: 2, 2>}, {transform_indices = @transform_1, window_bounds = array<i64: 2, 2>}, {transform_indices = @transform_2, window_bounds = array<i64: 2, 128>}, {transform_indices = @transform_3, window_bounds = array<i64: 2, 128>}, {transform_indices = @transform_4, window_bounds = array<i64: 2, 128>}, {transform_indices = @transform_5, window_bounds = array<i64: 2, 64>}]} {
    %c0 = arith.constant 0 : index
    %c0_0 = arith.constant 0 : index
    %0 = vector.load %arg1[%c0, %c0_0] : memref<2x2xf32, #tpu.memory_space<vmem>>, vector<2x1xf32>
    %c0_1 = arith.constant 0 : index
    %c0_2 = arith.constant 0 : index
    %1 = vector.load %arg2[%c0_1, %c0_2] : memref<2x2xf32, #tpu.memory_space<vmem>>, vector<2x1xf32>
    %2 = arith.addf %0, %1 : vector<2x1xf32>
    %cst = arith.constant 1.000000e+00 : f32
    %3 = vector.broadcast %cst : f32 to vector<2x1xf32>
    %4 = arith.mulf %2, %3 : vector<2x1xf32>
    %c0_3 = arith.constant 0 : index
    %c1 = arith.constant 1 : index
    %5 = vector.load %arg1[%c0_3, %c1] : memref<2x2xf32, #tpu.memory_space<vmem>>, vector<2x1xf32>
    %c0_4 = arith.constant 0 : index
    %c1_5 = arith.constant 1 : index
    %6 = vector.load %arg2[%c0_4, %c1_5] : memref<2x2xf32, #tpu.memory_space<vmem>>, vector<2x1xf32>
    %7 = arith.addf %5, %6 : vector<2x1xf32>
    %cst_6 = arith.constant 1.000000e+00 : f32
    %8 = vector.broadcast %cst_6 : f32 to vector<2x1xf32>
    %9 = arith.mulf %7, %8 : vector<2x1xf32>
    %10 = arith.maximumf %4, %9 : vector<2x1xf32>
    %11 = arith.subf %4, %10 : vector<2x1xf32>
    %12 = math.exp %11 : vector<2x1xf32>
    %13 = arith.subf %9, %10 : vector<2x1xf32>
    %14 = math.exp %13 : vector<2x1xf32>
    %15 = arith.addf %12, %14 : vector<2x1xf32>
    %cst_7 = arith.constant 1.000000e+00 : f32
    %16 = vector.broadcast %cst_7 : f32 to vector<2x1xf32>
    %17 = arith.divf %16, %15 : vector<2x1xf32>
    %18 = arith.mulf %12, %17 : vector<2x1xf32>
    %c0_8 = arith.constant 0 : index
    %c0_9 = arith.constant 0 : index
    %19 = vector.load %arg5[%c0_8, %c0_9] : memref<2x128xf32, #tpu.memory_space<vmem>>, vector<2x64xf32>
    %c0_10 = arith.constant 0 : index
    %c0_11 = arith.constant 0 : index
    %20 = vector.load %arg4[%c0_10, %c0_11] : memref<2x128xf32, #tpu.memory_space<vmem>>, vector<2x64xf32>
    %21 = arith.mulf %19, %20 : vector<2x64xf32>
    %c0_12 = arith.constant 0 : index
    %c0_13 = arith.constant 0 : index
    %22 = vector.load %arg3[%c0_12, %c0_13] : memref<2x128xf32, #tpu.memory_space<vmem>>, vector<2x64xf32>
    %23 = arith.addf %21, %22 : vector<2x64xf32>
    %24 = vector.broadcast %18 : vector<2x1xf32> to vector<2x64xf32>
    %25 = arith.mulf %24, %23 : vector<2x64xf32>
    %26 = arith.mulf %14, %17 : vector<2x1xf32>
    %c0_14 = arith.constant 0 : index
    %c64 = arith.constant 64 : index
    %27 = vector.load %arg5[%c0_14, %c64] : memref<2x128xf32, #tpu.memory_space<vmem>>, vector<2x64xf32>
    %c0_15 = arith.constant 0 : index
    %c64_16 = arith.constant 64 : index
    %28 = vector.load %arg4[%c0_15, %c64_16] : memref<2x128xf32, #tpu.memory_space<vmem>>, vector<2x64xf32>
    %29 = arith.mulf %27, %28 : vector<2x64xf32>
    %c0_17 = arith.constant 0 : index
    %c64_18 = arith.constant 64 : index
    %30 = vector.load %arg3[%c0_17, %c64_18] : memref<2x128xf32, #tpu.memory_space<vmem>>, vector<2x64xf32>
    %31 = arith.addf %29, %30 : vector<2x64xf32>
    %32 = vector.broadcast %26 : vector<2x1xf32> to vector<2x64xf32>
    %33 = arith.mulf %32, %31 : vector<2x64xf32>
    %34 = arith.addf %25, %33 : vector<2x64xf32>
    %c0_19 = arith.constant 0 : index
    %c0_20 = arith.constant 0 : index
    %35 = vector.load %arg6[%c0_19, %c0_20] : memref<2x64xf32, #tpu.memory_space<vmem>>, vector<2x64xf32>
    tpu.vector_store %arg6[%c0_19, %c0_20], %34 {strides = array<i32>} : memref<2x64xf32, #tpu.memory_space<vmem>>, vector<2x64xf32>,
    return
  }
  func.func @transform_0(%arg0: i32) -> (i32, i32) {
    %c0_i32 = arith.constant 0 : i32
    %c0_i32_0 = arith.constant 0 : i32
    return %arg0, %c0_i32 : i32, i32
  }
  func.func @transform_1(%arg0: i32) -> (i32, i32) {
    %c0_i32 = arith.constant 0 : i32
    %c0_i32_0 = arith.constant 0 : i32
    return %arg0, %c0_i32 : i32, i32
  }
  func.func @transform_2(%arg0: i32) -> (i32, i32) {
    %c0_i32 = arith.constant 0 : i32
    %c0_i32_0 = arith.constant 0 : i32
    return %arg0, %c0_i32 : i32, i32
  }
  func.func @transform_3(%arg0: i32) -> (i32, i32) {
    %c0_i32 = arith.constant 0 : i32
    %c0_i32_0 = arith.constant 0 : i32
    return %arg0, %c0_i32 : i32, i32
  }
  func.func @transform_4(%arg0: i32) -> (i32, i32) {
    %c0_i32 = arith.constant 0 : i32
    %c0_i32_0 = arith.constant 0 : i32
    return %arg0, %c0_i32 : i32, i32
  }
  func.func @transform_5(%arg0: i32) -> (i32, i32) {
    %c0_i32 = arith.constant 0 : i32
    %c0_i32_0 = arith.constant 0 : i32
    return %arg0, %c0_i32 : i32, i32
  }
}

</mosaic_0001>

<bundles_post_ra>
// kernel: tpu_custom_call.1
= control target key start
LH: loop header
LB: loop body
LE: loop exit
PB: predicated region body
PF: predicated region fallthrough
CT: control target
= control target key end

     0   :  { %10 = vsyncpa [#allocation3], 0  ;;  %s239_s0 = inlined_call_operand.hbm [shape: f32[2,2], index: 0, kind: input, shape index: {}]   ;;  %s240_s1 = inlined_call_operand.vmem [shape: f32[2,2], index: 1, kind: input, shape index: {}]   ;;  %s241_s2 = inlined_call_operand.vmem [shape: f32[2,128], index: 2, kind: input, shape index: {}]   ;;  %s242_s3 = inlined_call_operand.vmem [shape: f32[2,128], index: 3, kind: input, shape index: {}]   ;;  %s243_s4 = inlined_call_operand.vmem [shape: f32[2,128], index: 4, kind: input, shape index: {}]   ;;  %s244_s5 = inlined_call_operand.hbm [shape: f32[2,64], index: 5, kind: output, shape index: {}]  }
   0x1   :  { %11 = vsyncpa [#allocation4], 0  ;;  %s166_s18 = smov [#allocation2]   ;;  %s118_s22 = scalar_lea.hbm %s239_s0, 32 }
   0x2   :  { %s18_s19 = sshll.u32 %s166_s18, 4  ;;  %p119_p0 = scmp.ne.s32.totalorder %s239_s0, %s118_s22  ;;  %s19_s19 = int_to_ptr.vmem [resolvable:$true] %s18_s19 }
   0x3   :  { %p122_p1 = scmp.lt.u32.totalorder %s118_s22, %s239_s0 }
   0x5   :  { %p124_p2 = pnand %p122_p1, %p119_p0 }
   0x7   :  { %127 = shalt.err (!%p124_p2)
}
   0x8   :  { %s128_s27 = scalar_lea.vmem %s19_s19, 32  ;;  %p133_p4 = scmp.lt.s32.totalorder %s19_s19, %s19_s19 }
   0x9   :  { %p129_p3 = scmp.ne.s32.totalorder %s19_s19, %s128_s27  ;;  %p134_p5 = scmp.lt.s32.totalorder %s128_s27, %s128_s27 }
   0xb   :  { %p135_p6 = por %p134_p5, %p133_p4 }
   0xd   :  { %p136_p7 = pnand %p135_p6, %p129_p3 }
   0xf   :  { %139 = shalt.err (!%p136_p7)
}
  0x10   :  { %21 = dma.hbm_to_vmem [thread:$0]  %s239_s0, 32, %s19_s19, [#allocation3]  }
  0x11   :  { %162 = dma.done.wait [#allocation3], 32  }
  0x12   :  { %163 = vsyncadd [#allocation3], 4294967264  ;;  %v33_v0 = vld [vmem:[#allocation2] sm:$0x3]  ;;  %s167_s7 = smov 127   ;;  %s168_s8 = smov 1  }
  0x13   :  { %v34_v1 = vld [vmem:[%s240_s1] sm:$0x3]  ;;  %v169_v9 = vmov 0   ;;  %v170_v15 = vmov 1   ;;  %s171_s13 = smov 64   ;;  %s172_s14 = smov [#allocation5]  }
  0x14   :  { %v35_v2 = vadd.f32 %v34_v1, %v33_v0  ;;  %111 = vset.pattern.permute.xlu1 %v169_v9  ;;  %110 = vset.pattern.permute.xlu0 %v170_v15  ;;  %v59_v20 = vld [vmem:[%s243_s4] sm:$0x3]  ;;  %s94_s15 = sshll.u32 %s172_s14, 4  ;;  %vm86_vm0 = vcmask 517120   ;;  %s95_s15 = int_to_ptr.vmem [resolvable:$true] %s94_s15 }
  0x15   :  { %v60_v21 = vld [vmem:[%s242_s3] sm:$0x3]  ;;  %s140_s3 = scalar_lea.vmem %s95_s15, 32  ;;  %p145_p9 = scmp.lt.s32.totalorder %s95_s15, %s95_s15 }
  0x16   :  { %37 = vrot.lane.b32.xlu0 %v35_v2, %s167_s7  ;;  %v61_v22 = vmul.f32 %v60_v21, %v59_v20  ;;  %v62_v23 = vld [vmem:[%s241_s2] sm:$0x3]  ;;  %p141_p8 = scmp.ne.s32.totalorder %s95_s15, %s140_s3  ;;  %p146_p10 = scmp.lt.s32.totalorder %s140_s3, %s140_s3 }
  0x18   :  { %v63_v24 = vadd.f32 %v62_v23, %v61_v22  ;;  %p147_p11 = por %p146_p10, %p145_p9 }
  0x1a   :  { %p148_p12 = pnand %p147_p11, %p141_p8 }
  0x88   :  { %v38_v3 = vpop.permute.xlu0 %37 }
  0x89   :  { %v40_v4 = vmax.f32 %v35_v2, %v38_v3 }
  0x8b   :  { %45 = vrot.lane.b32.xlu0 %v40_v4, %s168_s8  ;;  %v41_v10 = vsub.f32 %v35_v2, %v40_v4 }
  0x8d   :  { %v42_v11 = vmul.f32 1.442695, %v41_v10 }
  0xfd   :  { %v46_v5 = vpop.permute.xlu0 %45 }
  0xfe   :  { %v48_v6 = vsub.f32 %v35_v2, %v46_v5 }
 0x100   :  { %v49_v7 = vmul.f32 1.442695, %v48_v6 }
 0x102   :  { %112 = vpow2.f32 %v49_v7 }
 0x103   :  { %114 = vpow2.f32 %v42_v11 }
 0x10c   :  { %v113_v8 = vpop.eup %112 }
 0x10d   :  { %52 = vrot.lane.b32.xlu1 %v113_v8, %s167_s7  ;;  %v115_v12 = vpop.eup %114 }
 0x17f   :  { %v53_v13 = vpop.permute.xlu1 %52 }
 0x180   :  { %v55_v14 = vadd.f32 %v115_v12, %v53_v13 }
 0x182   :  { %116 = vrcp.f32 %v55_v14 }
 0x18c   :  { %v117_v16 = vpop.eup %116 }
 0x18d   :  { %71 = vrot.lane.b32.xlu1 %v117_v16, %s168_s8  ;;  %v58_v17 = vmul.f32 %v117_v16, %v115_v12 }
 0x191   :  { %66 = vperm.xlu1 %111, %v58_v17  }
 0x1ff   :  { %v72_v18 = vpop.permute.xlu1 %71 }
 0x200   :  { %v74_v19 = vmul.f32 %v113_v8, %v72_v18 }
 0x202   :  { %77 = vperm.xlu0 %110, %v74_v19  }
 0x210   :  { %v67_v27 = vpop.permute.xlu1 %66 }
 0x211   :  { %v69_v28 = vmul.f32 %v67_v27, %v63_v24 }
 0x281   :  { %v78_v25 = vpop.permute.xlu0 %77 }
 0x282   :  { %v80_v26 = vmul.f32 %v78_v25, %v63_v24 }
 0x284   :  { %82 = vrot.lane.b32.xlu1 %v80_v26, %s171_s13 }
 0x2f6   :  { %v83_v29 = vpop.permute.xlu1 %82 }
 0x2f7   :  { %v85_v30 = vadd.f32 %v83_v29, %v69_v28 }
 0x2f9   :  { %87 = vst.msk [vmem:[#allocation5] sm:$0x3] %vm86_vm0, %v85_v30 }
 0x2fa   :  { %151 = shalt.err (!%p148_p12)
}
 0x2fb   :  { %s152_s16 = scalar_lea.hbm %s244_s5, 32 }
 0x2fc   :  { %p153_p13 = scmp.ne.s32.totalorder %s244_s5, %s152_s16  ;;  %p156_p0 = scmp.lt.u32.totalorder %s152_s16, %s244_s5 }
 0x2fe   :  { %p158_p1 = pnand %p156_p0, %p153_p13 }
 0x300   :  { %161 = shalt.err (!%p158_p1)
}
 0x301   :  { %97 = dma.vmem_to_hbm [thread:$0]  %s95_s15, 32, %s244_s5, [#allocation4]  }
 0x302   :  { %164 = dma.done.wait [#allocation4], 32  }
 0x303   :  { %165 = vsyncadd [#allocation4], 4294967264 }
 0x304   :  { %101 = vsyncpa [#allocation3], 1 }
 0x305   :  { %102 = vsyncpa [#allocation4], 1 }

</bundles_post_ra>
